<compile_context>
chip_gen: v6e
topology: v6e:2x2x1
jax: 0.10.0
libtpu: 0.0.40
codegen_flags: <defaults>
</compile_context>

<pallas_src>
import jax
import jax.numpy as jnp
from jax.experimental import pallas as pl
from jax.experimental.pallas import tpu as pltpu

N_IN = 9        # fc1 input features
N_HIDDEN = 128  # fc1 output / fc2 input features
N_OUT = 3       # fc2 output features (actions)


def _round_up(n, m):
    return ((n + m - 1) // m) * m


def policy_kernel(xt_ref, w1t_ref, b1_ref, w2t_ref, b2_ref, out_ref):
    # xt_ref : (9, TB)    float32   -- x^T tile (batch along lanes)
    # w1t_ref: (128, 9)   float32   -- W1^T, VMEM-resident
    # b1_ref : (128, 1)   float32
    # w2t_ref: (3, 128)   float32   -- W2^T, VMEM-resident
    # b2_ref : (3, 1)     float32
    # out_ref: (3, TB)    float32   -- transposed probabilities, lane-dense

    # fc1 + ReLU, transposed:  h^T = W1^T @ x^T + b1
    h_t = jnp.dot(w1t_ref[...], xt_ref[...],
                  preferred_element_type=jnp.float32) + b1_ref[...]
    h_t = jnp.maximum(h_t, 0.0)

    # fc2, transposed:  logits^T = W2^T @ h^T + b2   -> (3, TB)
    logits_t = jnp.dot(w2t_ref[...], h_t,
                       preferred_element_type=jnp.float32) + b2_ref[...]

    # Numerically stable softmax over the 3 action sublanes (axis 0).
    m = jnp.max(logits_t, axis=0, keepdims=True)       # (1, TB)
    e = jnp.exp(logits_t - m)                           # (3, TB)
    denom = jnp.sum(e, axis=0, keepdims=True)           # (1, TB)
    out_ref[...] = e / denom                            # exact normalization


def policy_forward(x, w1, b1, w2, b2, *, block_b=2048):
    """x: (B, 9) f32, w1: (9,128), b1: (128,), w2: (128,3), b2: (3,)
    -> (B, 3) f32 action probabilities (softmax over axis 1)."""
    B = x.shape[0]

    # Balanced, lane-aligned batch tiles.
    grid_b = pl.cdiv(B, block_b)
    tb = _round_up(pl.cdiv(B, grid_b), 128)
    b_pad = grid_b * tb

    # Transposed operands (tiny one-time XLA transposes; padded batch columns
    # are zeros -> finite logits -> harmless softmax rows that get sliced off).
    x_t = jnp.pad(x, ((0, b_pad - B), (0, 0))).T          # (9, b_pad)
    w1_t = w1.T                                            # (128, 9)
    b1_c = jnp.reshape(b1, (N_HIDDEN, 1))                  # (128, 1)
    w2_t = w2.T                                            # (3, 128)
    b2_c = jnp.reshape(b2, (N_OUT, 1))                     # (3, 1)

    grid_spec = pltpu.PrefetchScalarGridSpec(
        num_scalar_prefetch=0,
        grid=(grid_b,),
        in_specs=[
            pl.BlockSpec((N_IN, tb), lambda i: (0, i)),          # x^T tile
            pl.BlockSpec((N_HIDDEN, N_IN), lambda i: (0, 0)),    # W1^T resident
            pl.BlockSpec((N_HIDDEN, 1), lambda i: (0, 0)),       # b1 resident
            pl.BlockSpec((N_OUT, N_HIDDEN), lambda i: (0, 0)),   # W2^T resident
            pl.BlockSpec((N_OUT, 1), lambda i: (0, 0)),          # b2 resident
        ],
        out_specs=pl.BlockSpec((N_OUT, tb), lambda i: (0, i)),   # probs^T tile
    )

    out_t = pl.pallas_call(
        policy_kernel,
        out_shape=jax.ShapeDtypeStruct((N_OUT, b_pad), jnp.float32),
        grid_spec=grid_spec,
        compiler_params=pltpu.CompilerParams(
            dimension_semantics=("parallel",),  # megacore split on v7x
        ),
    )(x_t, w1_t, b1_c, w2_t, b2_c)

    return out_t[:, :B].T                                   # (B, 3)


def init_params(key):
    """Deterministic init matching nn.Linear shapes (stored as (in, out))."""
    k1, k2, k3, k4 = jax.random.split(key, 4)
    bound1 = 1.0 / jnp.sqrt(9.0)
    bound2 = 1.0 / jnp.sqrt(128.0)
    w1 = jax.random.uniform(k1, (N_IN, N_HIDDEN), jnp.float32, -bound1, bound1)
    b1 = jax.random.uniform(k2, (N_HIDDEN,), jnp.float32, -bound1, bound1)
    w2 = jax.random.uniform(k3, (N_HIDDEN, N_OUT), jnp.float32, -bound2, bound2)
    b2 = jax.random.uniform(k4, (N_OUT,), jnp.float32, -bound2, bound2)
    return w1, b1, w2, b2


def reference_forward(x, w1, b1, w2, b2):
    h = jnp.maximum(x @ w1 + b1, 0.0)
    logits = h @ w2 + b2
    return jax.nn.softmax(logits, axis=1)


if __name__ == "__main__":
    key = jax.random.PRNGKey(0)
    kx, kp = jax.random.split(key)

    B = 10  # small batch; not a multiple of 8/128 to exercise the padding path
    x = jax.random.normal(kx, (B, N_IN), dtype=jnp.float32)
    w1, b1, w2, b2 = init_params(kp)

    out = policy_forward(x, w1, b1, w2, b2)
    out = jax.block_until_ready(out)

    ref = reference_forward(x, w1, b1, w2, b2)
    assert out.shape == (B, N_OUT)
    # Exact normalization -> row sums ~ 1 to fp rounding.
    assert jnp.allclose(jnp.sum(out, axis=1), 1.0, atol=1e-4)
    # Loose-ish tolerance to cover hardware MXU bf16-pass f32 matmuls; interpret
    # mode matches to ~1e-7.
    assert jnp.allclose(out, ref, atol=2e-3, rtol=2e-3)

    print("KERNEL_OK")
</pallas_src>

<mosaic_0001>
module attributes {stable_mosaic.version = 11 : i64} {
  func.func @policy_kernel(%arg0: i32, %arg1: memref<9x128xf32, #tpu.memory_space<vmem>>, %arg2: memref<128x9xf32, #tpu.memory_space<vmem>>, %arg3: memref<128x1xf32, #tpu.memory_space<vmem>>, %arg4: memref<3x128xf32, #tpu.memory_space<vmem>>, %arg5: memref<3x1xf32, #tpu.memory_space<vmem>>, %arg6: memref<3x128xf32, #tpu.memory_space<vmem>>) attributes {dimension_semantics = [#tpu.dimension_semantics<parallel>], iteration_bounds = array<i64: 1>, scalar_prefetch = 0 : i64, scratch_operands = 0 : i64, tpu.core_type = #tpu.core_type<tc>, window_params = [{transform_indices = @transform_0, window_bounds = array<i64: 9, 128>}, {pipeline_mode = #tpu.pipeline_mode<synchronous>, transform_indices = @transform_1, window_bounds = array<i64: 128, 9>}, {pipeline_mode = #tpu.pipeline_mode<synchronous>, transform_indices = @transform_2, window_bounds = array<i64: 128, 1>}, {pipeline_mode = #tpu.pipeline_mode<synchronous>, transform_indices = @transform_3, window_bounds = array<i64: 3, 128>}, {pipeline_mode = #tpu.pipeline_mode<synchronous>, transform_indices = @transform_4, window_bounds = array<i64: 3, 1>}, {transform_indices = @transform_5, window_bounds = array<i64: 3, 128>}]} {
    %c0 = arith.constant 0 : index
    %c0_0 = arith.constant 0 : index
    %0 = vector.load %arg2[%c0, %c0_0] : memref<128x9xf32, #tpu.memory_space<vmem>>, vector<128x9xf32>
    %c0_1 = arith.constant 0 : index
    %c0_2 = arith.constant 0 : index
    %1 = vector.load %arg1[%c0_1, %c0_2] : memref<9x128xf32, #tpu.memory_space<vmem>>, vector<9x128xf32>
    %cst = arith.constant dense<0.000000e+00> : vector<128x128xf32>
    %2 = tpu.matmul %0, %1, %cst {dimension_numbers = #tpu.dot_dimension_numbers<[1], [0], [0], [1], [0, 0, 1, 1], [], []>} : vector<128x9xf32>, vector<9x128xf32>, vector<128x128xf32> -> vector<128x128xf32>
    %c0_3 = arith.constant 0 : index
    %c0_4 = arith.constant 0 : index
    %3 = vector.load %arg3[%c0_3, %c0_4] : memref<128x1xf32, #tpu.memory_space<vmem>>, vector<128x1xf32>
    %4 = vector.broadcast %3 : vector<128x1xf32> to vector<128x128xf32>
    %5 = arith.addf %2, %4 : vector<128x128xf32>
    %cst_5 = arith.constant 0.000000e+00 : f32
    %6 = vector.broadcast %cst_5 : f32 to vector<128x128xf32>
    %7 = arith.maximumf %5, %6 : vector<128x128xf32>
    %c0_6 = arith.constant 0 : index
    %c0_7 = arith.constant 0 : index
    %8 = vector.load %arg4[%c0_6, %c0_7] : memref<3x128xf32, #tpu.memory_space<vmem>>, vector<3x128xf32>
    %cst_8 = arith.constant dense<0.000000e+00> : vector<3x128xf32>
    %9 = tpu.matmul %8, %7, %cst_8 {dimension_numbers = #tpu.dot_dimension_numbers<[1], [0], [0], [1], [0, 0, 1, 1], [], []>} : vector<3x128xf32>, vector<128x128xf32>, vector<3x128xf32> -> vector<3x128xf32>
    %c0_9 = arith.constant 0 : index
    %c0_10 = arith.constant 0 : index
    %10 = vector.load %arg5[%c0_9, %c0_10] : memref<3x1xf32, #tpu.memory_space<vmem>>, vector<3x1xf32>
    %11 = vector.broadcast %10 : vector<3x1xf32> to vector<3x128xf32>
    %12 = arith.addf %9, %11 : vector<3x128xf32>
    %cst_11 = arith.constant dense<0xFF800000> : vector<128xf32>
    %13 = vector.multi_reduction <maximumf>, %12, %cst_11 [0] : vector<3x128xf32> to vector<128xf32>
    %14 = vector.shape_cast %13 : vector<128xf32> to vector<1x128xf32>
    %15 = vector.broadcast %14 : vector<1x128xf32> to vector<3x128xf32>
    %16 = arith.subf %12, %15 : vector<3x128xf32>
    %17 = math.exp %16 : vector<3x128xf32>
    %cst_12 = arith.constant dense<0.000000e+00> : vector<128xf32>
    %18 = vector.multi_reduction <add>, %17, %cst_12 [0] : vector<3x128xf32> to vector<128xf32>
    %19 = vector.shape_cast %18 : vector<128xf32> to vector<1x128xf32>
    %20 = vector.broadcast %19 : vector<1x128xf32> to vector<3x128xf32>
    %21 = arith.divf %17, %20 : vector<3x128xf32>
    %c0_13 = arith.constant 0 : index
    %c0_14 = arith.constant 0 : index
    %22 = vector.load %arg6[%c0_13, %c0_14] : memref<3x128xf32, #tpu.memory_space<vmem>>, vector<3x128xf32>
    tpu.vector_store %arg6[%c0_13, %c0_14], %21 {strides = array<i32>} : memref<3x128xf32, #tpu.memory_space<vmem>>, vector<3x128xf32>,
    return
  }
  func.func @transform_0(%arg0: i32) -> (i32, i32) {
    %c0_i32 = arith.constant 0 : i32
    %c0_i32_0 = arith.constant 0 : i32
    return %c0_i32, %arg0 : i32, i32
  }
  func.func @transform_1(%arg0: i32) -> (i32, i32) {
    %c0_i32 = arith.constant 0 : i32
    %c0_i32_0 = arith.constant 0 : i32
    %c0_i32_1 = arith.constant 0 : i32
    return %c0_i32, %c0_i32_0 : i32, i32
  }
  func.func @transform_2(%arg0: i32) -> (i32, i32) {
    %c0_i32 = arith.constant 0 : i32
    %c0_i32_0 = arith.constant 0 : i32
    %c0_i32_1 = arith.constant 0 : i32
    return %c0_i32, %c0_i32_0 : i32, i32
  }
  func.func @transform_3(%arg0: i32) -> (i32, i32) {
    %c0_i32 = arith.constant 0 : i32
    %c0_i32_0 = arith.constant 0 : i32
    %c0_i32_1 = arith.constant 0 : i32
    return %c0_i32, %c0_i32_0 : i32, i32
  }
  func.func @transform_4(%arg0: i32) -> (i32, i32) {
    %c0_i32 = arith.constant 0 : i32
    %c0_i32_0 = arith.constant 0 : i32
    %c0_i32_1 = arith.constant 0 : i32
    return %c0_i32, %c0_i32_0 : i32, i32
  }
  func.func @transform_5(%arg0: i32) -> (i32, i32) {
    %c0_i32 = arith.constant 0 : i32
    %c0_i32_0 = arith.constant 0 : i32
    return %c0_i32, %arg0 : i32, i32
  }
}

</mosaic_0001>

<bundles_post_ra>
// kernel: tpu_custom_call.1
= control target key start
LH: loop header
LB: loop body
LE: loop exit
PB: predicated region body
PF: predicated region fallthrough
CT: control target
= control target key end

     0   :  { %vm184_vm0 = vcmask 1040384   ;;  %vm135_vm1 = vcmask 72704   ;;  %v608_v4 = vmov 0   ;;  %s798_s0 = inlined_call_operand.vmem [shape: f32[9,128], index: 0, kind: input, shape index: {}]   ;;  %s799_s1 = inlined_call_operand.vmem [shape: f32[128,9], index: 1, kind: input, shape index: {}]   ;;  %s800_s2 = inlined_call_operand.vmem [shape: f32[128,1], index: 2, kind: input, shape index: {}]   ;;  %s801_s3 = inlined_call_operand.vmem [shape: f32[3,128], index: 3, kind: input, shape index: {}]   ;;  %s802_s4 = inlined_call_operand.vmem [shape: f32[3,1], index: 4, kind: input, shape index: {}]   ;;  %s803_s5 = inlined_call_operand.hbm [shape: f32[3,128], index: 5, kind: output, shape index: {}]  }
   0x1   :  { %v38_v0 = vld [vmem:[%s798_s0 + $0x8] sm:$0x1]  ;;  %v37_v1 = vld [vmem:[%s798_s0] sm:$0xff]  ;;  %580 = vset.pattern.permute.xlu0 %v608_v4  ;;  %v23_v5 = vld [vmem:[%s799_s1 + $0x10] sm:$0xff]  ;;  %581 = vset.pattern.permute.xlu1 %v608_v4 }
   0x2   :  { %v21_v2 = vld [vmem:[%s799_s1] sm:$0xff]  ;;  %513 = vmatprep.subr.msk.mxu0 %vm184_vm0, %v38_v0  ;;  %v22_v3 = vld [vmem:[%s799_s1 + $0x8] sm:$0xff]  ;;  %v24_v6 = vld [vmem:[%s799_s1 + $0x18] sm:$0xff] }
   0x3   :  { %517 = vmatprep.mubr.msk.f32.mxu0 %vm135_vm1, %v21_v2  ;;  %514 = vmatpush3.msk.msra.mxu0 %vm184_vm0, %v38_v0  ;;  %v54_v7 = vld [vmem:[%s800_s2 + $0x78] sm:$0xff]  ;;  %v52_v8 = vld [vmem:[%s800_s2 + $0x68] sm:$0xff]  ;;  %v25_v9 = vld [vmem:[%s799_s1 + $0x20] sm:$0xff] }
   0x4   :  { %515 = vmatprep.subr.mxu0 %v37_v1  ;;  %132 = vperm.xlu0 %580, %v54_v7   ;;  %v53_v10 = vld [vmem:[%s800_s2 + $0x70] sm:$0xff]  ;;  %v51_v11 = vld [vmem:[%s800_s2 + $0x60] sm:$0xff]  ;;  %v26_v12 = vld [vmem:[%s799_s1 + $0x28] sm:$0xff] }
   0x5   :  { %516 = vmatpush3.msra.mxu0 %v37_v1  ;;  %122 = vperm.xlu1 %581, %v52_v8   ;;  %v27_v13 = vld [vmem:[%s799_s1 + $0x30] sm:$0xff] }
   0x6   :  { %518 = vmatmul.mubr.msk.f32.vlgmr.msra.gmra.mxu0 %vm135_vm1, %v22_v3 }
   0x7   :  { %520 = vmatprep.mubr.msk.f32.mxu0 %vm135_vm1, %v23_v5 }
   0x8   :  { %127 = vperm.xlu0 %580, %v53_v10  }
   0x9   :  { %117 = vperm.xlu1 %581, %v51_v11  }
   0xa   :  { %521 = vmatmul.mubr.msk.f32.gmra.mxu0 %vm135_vm1, %v24_v6 }
   0xb   :  { %523 = vmatprep.mubr.msk.f32.mxu0 %vm135_vm1, %v25_v9 }
   0xc   :  { %10 = vsyncpa [#allocation3], 0  ;;  %v50_v14 = vld [vmem:[%s800_s2 + $0x58] sm:$0xff]  ;;  %v49_v15 = vld [vmem:[%s800_s2 + $0x50] sm:$0xff]  ;;  %v609_v36 = vmov 0.0   ;;  %vm610_vm2 = vmmov 0  }
   0xd   :  { %v28_v16 = vld [vmem:[%s799_s1 + $0x38] sm:$0xff]  ;;  %v29_v17 = vld [vmem:[%s799_s1 + $0x40] sm:$0xff]  ;;  %112 = vperm.xlu0 %580, %v50_v14   ;;  %107 = vperm.xlu1 %581, %v49_v15   ;;  %v48_v18 = vld [vmem:[%s800_s2 + $0x48] sm:$0xff]  ;;  %vm426_vm3 = vcmask 1042432  }
   0xe   :  { %524 = vmatmul.mubr.msk.f32.gmra.mxu0 %vm135_vm1, %v26_v12  ;;  %v47_v19 = vld [vmem:[%s800_s2 + $0x40] sm:$0xff]  ;;  %v30_v20 = vld [vmem:[%s799_s1 + $0x48] sm:$0xff]  ;;  %v31_v21 = vld [vmem:[%s799_s1 + $0x50] sm:$0xff]  ;;  %541 = vmatprep.subr.mxu1 %v609_v36 }
   0xf   :  { %526 = vmatprep.mubr.msk.f32.mxu0 %vm135_vm1, %v27_v13  ;;  %v46_v22 = vld [vmem:[%s800_s2 + $0x38] sm:$0xff]  ;;  %v45_v23 = vld [vmem:[%s800_s2 + $0x30] sm:$0xff]  ;;  %v33_v25 = vld [vmem:[%s799_s1 + $0x60] sm:$0xff]  ;;  %573 = vmatprep.mubr.msk.f32.mxu1 %vm610_vm2, %v609_v36 }
  0x10   :  { %v32_v24 = vld [vmem:[%s799_s1 + $0x58] sm:$0xff]  ;;  %v44_v26 = vld [vmem:[%s800_s2 + $0x28] sm:$0xff]  ;;  %v43_v27 = vld [vmem:[%s800_s2 + $0x20] sm:$0xff] }
  0x11   :  { %102 = vperm.xlu0 %580, %v48_v18   ;;  %97 = vperm.xlu1 %581, %v47_v19   ;;  %v34_v28 = vld [vmem:[%s799_s1 + $0x68] sm:$0xff]  ;;  %v35_v29 = vld [vmem:[%s799_s1 + $0x70] sm:$0xff]  ;;  %v42_v30 = vld [vmem:[%s800_s2 + $0x18] sm:$0xff] }
  0x12   :  { %527 = vmatmul.mubr.msk.f32.gmra.mxu0 %vm135_vm1, %v28_v16  ;;  %v41_v31 = vld [vmem:[%s800_s2 + $0x10] sm:$0xff]  ;;  %v36_v32 = vld [vmem:[%s799_s1 + $0x78] sm:$0xff]  ;;  %v40_v33 = vld [vmem:[%s800_s2 + $0x8] sm:$0xff] }
  0x13   :  { %529 = vmatprep.mubr.msk.f32.mxu0 %vm135_vm1, %v29_v17  ;;  %v39_v34 = vld [vmem:[%s800_s2] sm:$0xff] }
  0x14   :  { %v350_v35 = vld [vmem:[%s802_s4] sm:$0x7] }
  0x15   :  { %92 = vperm.xlu0 %580, %v46_v22   ;;  %87 = vperm.xlu1 %581, %v45_v23  }
  0x16   :  { %530 = vmatmul.mubr.msk.f32.gmra.mxu0 %vm135_vm1, %v30_v20 }
  0x17   :  { %532 = vmatprep.mubr.msk.f32.mxu0 %vm135_vm1, %v31_v21 }
  0x19   :  { %82 = vperm.xlu0 %580, %v44_v26   ;;  %77 = vperm.xlu1 %581, %v43_v27  }
  0x1a   :  { %533 = vmatmul.mubr.msk.f32.gmra.mxu0 %vm135_vm1, %v32_v24 }
  0x1b   :  { %535 = vmatprep.mubr.msk.f32.mxu0 %vm135_vm1, %v33_v25 }
  0x1d   :  { %72 = vperm.xlu0 %580, %v42_v30   ;;  %67 = vperm.xlu1 %581, %v41_v31  }
  0x1e   :  { %536 = vmatmul.mubr.msk.f32.gmra.mxu0 %vm135_vm1, %v34_v28 }
  0x1f   :  { %538 = vmatprep.mubr.msk.f32.mxu0 %vm135_vm1, %v35_v29 }
  0x21   :  { %62 = vperm.xlu0 %580, %v40_v33   ;;  %57 = vperm.xlu1 %581, %v39_v34  }
  0x22   :  { %539 = vmatmul.mubr.msk.f32.gmra.mxu0 %vm135_vm1, %v36_v32 }
  0x25   :  { %353 = vperm.xlu0 %580, %v350_v35  }
  0x7f   :  { %v133_v42 = vpop.permute.xlu0 %132 }
  0x80   :  { %v123_v44 = vpop.permute.xlu1 %122 }
  0x83   :  { %v128_v47 = vpop.permute.xlu0 %127 }
  0x84   :  { %v118_v49 = vpop.permute.xlu1 %117 }
  0x88   :  { %v113_v52 = vpop.permute.xlu0 %112  ;;  %v108_v54 = vpop.permute.xlu1 %107 }
  0x8c   :  { %v103_v57 = vpop.permute.xlu0 %102  ;;  %v98_v60 = vpop.permute.xlu1 %97 }
  0x90   :  { %v93_v3 = vpop.permute.xlu0 %92  ;;  %v88_v6 = vpop.permute.xlu1 %87 }
  0x94   :  { %v83_v11 = vpop.permute.xlu0 %82  ;;  %v78_v14 = vpop.permute.xlu1 %77 }
  0x98   :  { %v73_v19 = vpop.permute.xlu0 %72  ;;  %v68_v22 = vpop.permute.xlu1 %67 }
  0x9c   :  { %v63_v27 = vpop.permute.xlu0 %62  ;;  %v58_v30 = vpop.permute.xlu1 %57 }
  0xc6   :  { %v765_v37 = vpop.f32.mrf.mxu0 }
  0xc7   :  { %v260_v31 = vadd.f32 %v765_v37, %v63_v27  ;;  %v349_v37 = vld [vmem:[%s801_s3] sm:$0x7]  ;;  %s611_s3 = smov [#allocation2]  }
  0xc8   :  { %v767_v38 = vpop.f32.mrf.mxu0  ;;  %s453_s4 = sshll.u32 %s611_s3, 4  ;;  %s454_s4 = int_to_ptr.vmem [resolvable:$true] %s453_s4 }
  0xc9   :  { %v255_v33 = vadd.f32 %v767_v38, %v58_v30  ;;  %v334_v35 = vmax.f32 %v260_v31, 0.0  ;;  %s586_s10 = scalar_lea.vmem %s454_s4, 64  ;;  %p591_p1 = scmp.lt.s32.totalorder %s454_s4, %s454_s4 }
  0xca   :  { %v769_v39 = vpop.f32.mrf.mxu0  ;;  %p587_p0 = scmp.ne.s32.totalorder %s454_s4, %s586_s10  ;;  %p592_p2 = scmp.lt.s32.totalorder %s586_s10, %s586_s10 }
  0xcb   :  { %v270_v25 = vadd.f32 %v769_v39, %v73_v19  ;;  %v333_v39 = vmax.f32 %v255_v33, 0.0 }
  0xcc   :  { %v771_v40 = vpop.f32.mrf.mxu0  ;;  %p593_p3 = por %p592_p2, %p591_p1 }
  0xcd   :  { %v265_v28 = vadd.f32 %v771_v40, %v68_v22  ;;  %v336_v32 = vmax.f32 %v270_v25, 0.0  ;;  %v354_v40 = vpop.permute.xlu0 %353 }
  0xce   :  { %v525_v41 = vpop.f32.mrf.mxu0  ;;  %p594_p4 = pnand %p593_p3, %p587_p0 }
  0xcf   :  { %v280_v20 = vadd.f32 %v525_v41, %v83_v11  ;;  %v335_v34 = vmax.f32 %v265_v28, 0.0 }
  0xd0   :  { %v274_v43 = vpop.f32.mrf.mxu0 }
  0xd1   :  { %v275_v23 = vadd.f32 %v274_v43, %v78_v14  ;;  %v338_v26 = vmax.f32 %v280_v20, 0.0 }
  0xd2   :  { %v528_v45 = vpop.f32.mrf.mxu0 }
  0xd3   :  { %v290_v15 = vadd.f32 %v528_v45, %v93_v3  ;;  %v337_v29 = vmax.f32 %v275_v23, 0.0 }
  0xd4   :  { %v284_v46 = vpop.f32.mrf.mxu0 }
  0xd5   :  { %v285_v17 = vadd.f32 %v284_v46, %v88_v6  ;;  %v340_v21 = vmax.f32 %v290_v15, 0.0 }
  0xd6   :  { %v531_v48 = vpop.f32.mrf.mxu0 }
  0xd7   :  { %v300_v9 = vadd.f32 %v531_v48, %v103_v57  ;;  %v339_v24 = vmax.f32 %v285_v17, 0.0 }
  0xd8   :  { %v294_v50 = vpop.f32.mrf.mxu0 }
  0xd9   :  { %v295_v12 = vadd.f32 %v294_v50, %v98_v60  ;;  %v342_v16 = vmax.f32 %v300_v9, 0.0 }
  0xda   :  { %v534_v51 = vpop.f32.mrf.mxu0 }
  0xdb   :  { %v310_v4 = vadd.f32 %v534_v51, %v113_v52  ;;  %v341_v18 = vmax.f32 %v295_v12, 0.0 }
  0xdc   :  { %v304_v53 = vpop.f32.mrf.mxu0 }
  0xdd   :  { %v305_v7 = vadd.f32 %v304_v53, %v108_v54  ;;  %v344_v10 = vmax.f32 %v310_v4, 0.0 }
  0xde   :  { %v537_v55 = vpop.f32.mrf.mxu0 }
  0xdf   :  { %v320_v62 = vadd.f32 %v537_v55, %v123_v44  ;;  %v343_v13 = vmax.f32 %v305_v7, 0.0 }
  0xe0   :  { %v314_v56 = vpop.f32.mrf.mxu0 }
  0xe1   :  { %v315_v1 = vadd.f32 %v314_v56, %v118_v49  ;;  %v346_v5 = vmax.f32 %v320_v62, 0.0 }
  0xe2   :  { %v540_v58 = vpop.f32.mrf.mxu0 }
  0xe3   :  { %v330_v59 = vadd.f32 %v540_v58, %v133_v42  ;;  %v345_v8 = vmax.f32 %v315_v1, 0.0 }
  0xe4   :  { %v324_v61 = vpop.f32.mrf.mxu0 }
  0xe5   :  { %v348_v63 = vmax.f32 %v330_v59, 0.0  ;;  %v325_v0 = vadd.f32 %v324_v61, %v128_v47 }
  0xe7   :  { %v347_v2 = vmax.f32 %v325_v0, 0.0  ;;  %542 = vmatpush3.msra.mxu1 %v348_v63 }
  0xe8   :  { %543 = vmatprep.subr.mxu1 %v609_v36 }
  0xe9   :  { %544 = vmatpush3.msra.mxu1 %v347_v2 }
  0xea   :  { %545 = vmatprep.subr.mxu1 %v609_v36 }
  0xeb   :  { %546 = vmatpush3.msra.mxu1 %v346_v5 }
  0xec   :  { %547 = vmatprep.subr.mxu1 %v609_v36 }
  0xed   :  { %548 = vmatpush3.msra.mxu1 %v345_v8 }
  0xee   :  { %549 = vmatprep.subr.mxu1 %v609_v36 }
  0xef   :  { %550 = vmatpush3.msra.mxu1 %v344_v10 }
  0xf0   :  { %551 = vmatprep.subr.mxu1 %v609_v36 }
  0xf1   :  { %552 = vmatpush3.msra.mxu1 %v343_v13 }
  0xf2   :  { %553 = vmatprep.subr.mxu1 %v609_v36 }
  0xf3   :  { %554 = vmatpush3.msra.mxu1 %v342_v16 }
  0xf4   :  { %555 = vmatprep.subr.mxu1 %v609_v36 }
  0xf5   :  { %556 = vmatpush3.msra.mxu1 %v341_v18 }
  0xf6   :  { %557 = vmatprep.subr.mxu1 %v609_v36 }
  0xf7   :  { %558 = vmatpush3.msra.mxu1 %v340_v21 }
  0xf8   :  { %559 = vmatprep.subr.mxu1 %v609_v36 }
  0xf9   :  { %560 = vmatpush3.msra.mxu1 %v339_v24 }
  0xfa   :  { %561 = vmatprep.subr.mxu1 %v609_v36 }
  0xfb   :  { %562 = vmatpush3.msra.mxu1 %v338_v26 }
  0xfc   :  { %563 = vmatprep.subr.mxu1 %v609_v36 }
  0xfd   :  { %564 = vmatpush3.msra.mxu1 %v337_v29 }
  0xfe   :  { %565 = vmatprep.subr.mxu1 %v609_v36 }
  0xff   :  { %566 = vmatpush3.msra.mxu1 %v336_v32 }
 0x100   :  { %567 = vmatprep.subr.mxu1 %v609_v36 }
 0x101   :  { %568 = vmatpush3.msra.mxu1 %v335_v34 }
 0x102   :  { %569 = vmatprep.subr.mxu1 %v609_v36 }
 0x103   :  { %570 = vmatpush3.msra.mxu1 %v334_v35 }
 0x104   :  { %571 = vmatprep.subr.mxu1 %v609_v36 }
 0x105   :  { %572 = vmatpush3.msra.mxu1 %v333_v39 }
 0x106   :  { %574 = vmatmul.mubr.f32.vlgmr.msra.gmra.mxu1 %v349_v37 }
 0x1c6   :  { %v422_v38 = vpop.f32.mrf.mxu1 }
 0x1c7   :  { %v423_v41 = vadd.f32 %v422_v38, %v354_v40 }
 0x1c8   :  { %v575_v42 = vpop.f32.mrf.mxu1 }
 0x1c9   :  { %v427_v43 = vsel %vm426_vm3, %v423_v41, -inf }
 0x1ca   :  { %v428_v44 = vrot.slane %v427_v43, 4 }
 0x1cc   :  { %v429_v45 = vmax.f32 %v427_v43, %v428_v44 }
 0x1ce   :  { %v430_v46 = vrot.slane %v429_v45, 2 }
 0x1d0   :  { %v431_v47 = vmax.f32 %v429_v45, %v430_v46 }
 0x1d2   :  { %v432_v48 = vrot.slane %v431_v47, 1 }
 0x1d4   :  { %v433_v49 = vmax.f32 %v431_v47, %v432_v48 }
 0x1d6   :  { %v434_v50 = vsub.f32 %v423_v41, %v433_v49 }
 0x1d8   :  { %v435_v51 = vmul.f32 1.442695, %v434_v50 }
 0x1da   :  { %582 = vpow2.f32 %v435_v51 }
 0x1e7   :  { %v583_v52 = vpop.eup %582 }
 0x1e8   :  { %v437_v53 = vsel %vm426_vm3, %v583_v52, 0.0 }
 0x1e9   :  { %v438_v36 = vrot.slane %v437_v53, 4 }
 0x1eb   :  { %v439_v54 = vadd.f32 %v438_v36, %v437_v53 }
 0x1ed   :  { %v440_v55 = vrot.slane %v439_v54, 2 }
 0x1ef   :  { %v441_v56 = vadd.f32 %v440_v55, %v439_v54 }
 0x1f1   :  { %v442_v57 = vrot.slane %v441_v56, 1 }
 0x1f3   :  { %v443_v58 = vadd.f32 %v442_v57, %v441_v56 }
 0x1f5   :  { %584 = vrcp.f32 %v443_v58 }
 0x202   :  { %v585_v59 = vpop.eup %584 }
 0x203   :  { %v445_v60 = vmul.f32 %v585_v59, %v583_v52 }
 0x205   :  { %446 = vst [vmem:[#allocation2] sm:$0x7] %v445_v60 }
 0x206   :  { %597 = shalt.err (!%p594_p4)
}
 0x207   :  { %456 = dma.vmem_to_hbm [thread:$0]  %s454_s4, 64, %s803_s5, [#allocation3]  }
 0x208   :  { %606 = dma.done.wait [#allocation3], 64  }
 0x209   :  { %607 = vsyncadd [#allocation3], 4294967232 }
 0x20a   :  { %460 = vsyncpa [#allocation3], 1 }

</bundles_post_ra>
